<compile_context>
chip_gen: v7x
topology: tpu7x:2x2x1
jax: 0.10.0
libtpu: 0.0.40
codegen_flags: <defaults>
</compile_context>

<pallas_src>
import functools

import numpy as np
import jax
import jax.numpy as jnp
from jax.experimental import pallas as pl
from jax.experimental.pallas import tpu as pltpu

F32_EPS = float(np.finfo(np.float32).eps)
LANES = 128
SUBLANES = 8
MAX_TILE = 2048
SINGLE_TILE_MAX = 1024


def _a2c_kernel(dyn_ref, wx_ref, wo_ref, out_ref, *, n_out):
    dyn = dyn_ref[...]                                             # (tb, 128)

    # MXU pass 1: x + bias lane -> [outs pre-act | v (x part) | z3 (x part)] on 128 lanes.
    zx = jnp.dot(dyn, wx_ref[...], preferred_element_type=jnp.float32)
    sig = jax.nn.sigmoid(zx)                                       # lanes [0:n_out) = outs

    # MXU pass 2: folds outs.w2o and outs.(w3o + w3v*w2o); lanes n_out / n_out+1 of `pre`
    # become exactly v and the confidence pre-activation z3.
    pre = zx + jnp.dot(sig, wo_ref[...], preferred_element_type=jnp.float32)
    act = jax.nn.sigmoid(pre)                                      # lane n_out+1 = prob

    delta = (1.0 - act[:, n_out + 1:n_out + 2]) + F32_EPS          # (tb, 1) lane-broadcast
    lane = jax.lax.broadcasted_iota(jnp.int32, dyn.shape, 1)

    # Assemble the full output row in registers; dyn lanes [0:n_out) hold the +/- sign,
    # already aligned with the new_outs lanes.  Lanes >= n_out+2 are don't-care.
    row = jnp.where(lane < n_out, sig + dyn * delta,
                    jnp.where(lane == n_out, pre, act))
    out_ref[...] = row                                             # single unmasked vst


def pack_a2c_params(params):
    """One-time packing of the three nn.Linear layers into two 128x128 MXU tiles.

    dyn row layout (128 lanes): [ sign(n_out) | x(n_in) | 1.0 | zeros ]
    WX  rows: sign rows zero; x rows carry w1^T / w2x / (w3x + w3v*w2x); bias row carries
              b1 / b2 / (b3 + w3v*b2) in columns [0:n_out) / n_out / n_out+1.
    WO  rows: outs rows [0:n_out) carry w2o in column n_out and (w3o + w3v*w2o) in
              column n_out+1; everything else zero.
    """
    w1 = jnp.asarray(params["w1"], jnp.float32)   # (n_out, n_in)
    b1 = jnp.asarray(params["b1"], jnp.float32)   # (n_out,)
    w2 = jnp.asarray(params["w2"], jnp.float32)   # (1, n_in+n_out)
    b2 = jnp.asarray(params["b2"], jnp.float32)   # (1,)
    w3 = jnp.asarray(params["w3"], jnp.float32)   # (1, n_in+n_out+1)
    b3 = jnp.asarray(params["b3"], jnp.float32)   # (1,)

    n_out, n_in = w1.shape
    assert n_out + n_in + 1 <= LANES and n_out + 2 <= LANES

    w2x, w2o = w2[0, :n_in], w2[0, n_in:n_in + n_out]
    w3x, w3o, w3v = w3[0, :n_in], w3[0, n_in:n_in + n_out], w3[0, n_in + n_out]

    # Fold the confidence head's dependence on v (z3 = ... + w3v * v) into the weights.
    w3x_f = w3x + w3v * w2x
    w3o_f = w3o + w3v * w2o
    b3_f = b3[0] + w3v * b2[0]

    wx = jnp.zeros((LANES, LANES), jnp.float32)
    r0 = n_out                          # first x row (sign rows [0:n_out) stay zero)
    wx = wx.at[r0:r0 + n_in, 0:n_out].set(w1.T)
    wx = wx.at[r0:r0 + n_in, n_out].set(w2x)
    wx = wx.at[r0:r0 + n_in, n_out + 1].set(w3x_f)
    rb = r0 + n_in                      # bias row (dyn lane rb holds the constant 1.0)
    wx = wx.at[rb, 0:n_out].set(b1)
    wx = wx.at[rb, n_out].set(b2[0])
    wx = wx.at[rb, n_out + 1].set(b3_f)

    wo = jnp.zeros((LANES, LANES), jnp.float32)
    wo = wo.at[0:n_out, n_out].set(w2o)
    wo = wo.at[0:n_out, n_out + 1].set(w3o_f)
    return wx, wo


def _round_up(n, m):
    return -(-n // m) * m


def _choose_tiling(batch):
    b8 = _round_up(max(batch, 1), SUBLANES)
    if b8 <= SINGLE_TILE_MAX:
        return b8, b8                                    # one grid step, minimal pad
    if b8 <= 2 * MAX_TILE:
        tb = _round_up(-(-b8 // 2), SUBLANES)            # 2 steps -> both v7x TCs busy
        return _round_up(b8, tb), tb
    return _round_up(b8, MAX_TILE), MAX_TILE


@jax.jit
def a2c_forward(x, signs, wx, wo):
    """A2C forward for one state (x: (n_in,)) or a batch (x: (B, n_in)).

    Returns (new_outs, v, prob): the module's returned tensor plus the values it appends
    to v_list / prob_list.
    """
    single = x.ndim == 1
    x2 = x.reshape(1, -1) if single else x
    sg = signs.reshape(1, -1) if single else signs
    B, n_in = x2.shape
    n_out = sg.shape[-1]
    assert wx.shape == (LANES, LANES) and wo.shape == (LANES, LANES)
    assert n_out + n_in + 1 <= LANES

    b_pad, tb = _choose_tiling(B)

    # dyn row: [ sign | x | 1.0 | zeros ]  -- one concat + one pad.
    core = jnp.concatenate(
        [sg.astype(jnp.float32), x2.astype(jnp.float32),
         jnp.ones((B, 1), jnp.float32)], axis=1)
    dyn = jnp.pad(core, ((0, b_pad - B), (0, LANES - core.shape[1])))

    grid = b_pad // tb
    cost = pl.CostEstimate(
        flops=4 * b_pad * LANES * LANES,           # two (tb,128)x(128,128) dots per row
        transcendentals=2 * b_pad * LANES,         # two full-width sigmoids
        bytes_accessed=2 * b_pad * LANES * 4 + 2 * LANES * LANES * 4)

    out = pl.pallas_call(
        functools.partial(_a2c_kernel, n_out=n_out),
        out_shape=jax.ShapeDtypeStruct((b_pad, LANES), jnp.float32),
        grid=(grid,),
        in_specs=[
            pl.BlockSpec((tb, LANES), lambda i: (i, 0)),       # dynamic [sign|x|1] rows
            pl.BlockSpec((LANES, LANES), lambda i: (0, 0)),    # WX (resident)
            pl.BlockSpec((LANES, LANES), lambda i: (0, 0)),    # WO (resident)
        ],
        out_specs=pl.BlockSpec((tb, LANES), lambda i: (i, 0)),
        compiler_params=pltpu.CompilerParams(
            dimension_semantics=("parallel",)),
        cost_estimate=cost,
    )(dyn, wx, wo)

    new_outs = out[:B, 0:n_out]
    v = out[:B, n_out:n_out + 1]
    prob = out[:B, n_out + 1:n_out + 2]
    if single:
        # torch.squeeze(torch.cat(new_outs)) -> (n_out,);  v, prob -> (1,)
        return new_outs[0], v[0], prob[0]
    return new_outs, v, prob


def _init_linear(key, fan_in, fan_out):
    # Deterministic emulation of PyTorch's default Linear init: U(+-1/sqrt(fan_in)).
    kw, kb = jax.random.split(key)
    bound = 1.0 / np.sqrt(fan_in)
    w = jax.random.uniform(kw, (fan_out, fan_in), jnp.float32, -bound, bound)
    b = jax.random.uniform(kb, (fan_out,), jnp.float32, -bound, bound)
    return w, b


def _reference_forward(x, params, signs):
    # Pure-JAX reference mirroring the PyTorch forward line by line.
    outs = jax.nn.sigmoid(x @ params["w1"].T + params["b1"])
    xc = jnp.concatenate([x, outs], axis=0)
    v = xc @ params["w2"].T + params["b2"]
    xc2 = jnp.concatenate([xc, v], axis=0)
    prob = jax.nn.sigmoid(xc2 @ params["w3"].T + params["b3"])
    delta = (1.0 - prob) + F32_EPS
    new_outs = outs + signs * jnp.squeeze(delta)
    return new_outs, v, prob


if __name__ == "__main__":
    n_inputs, n_outputs = 16, 8

    key = jax.random.PRNGKey(0)
    (k_x, k_l1, k_l2, k_l3, k_sign, k_bx, k_bs, k_gx, k_gs) = jax.random.split(key, 9)

    w1, b1 = _init_linear(k_l1, n_inputs, n_outputs)
    w2, b2 = _init_linear(k_l2, n_inputs + n_outputs, 1)
    w3, b3 = _init_linear(k_l3, n_inputs + n_outputs + 1, 1)
    params = {"w1": w1, "b1": b1, "w2": w2, "b2": b2, "w3": w3, "b3": b3}

    # One-time parameter packing, kept resident across RL steps.
    wx, wo = jax.block_until_ready(pack_a2c_params(params))

    # --- single state: exactly the module's forward ---
    x = jax.random.normal(k_x, (n_inputs,), jnp.float32)
    # TODO(synk): the original draws np.random.random() per output element on the host;
    # the +/- coin flip is reproduced with a fixed jax.random seed instead.
    signs = jnp.where(jax.random.bernoulli(k_sign, 0.5, (n_outputs,)), 1.0, -1.0)

    new_outs, v, prob = a2c_forward(x, signs, wx, wo)
    jax.block_until_ready((new_outs, v, prob))

    ref_outs, ref_v, ref_prob = _reference_forward(x, params, signs)
    np.testing.assert_allclose(np.asarray(new_outs), np.asarray(ref_outs),
                               rtol=1e-5, atol=1e-5)
    np.testing.assert_allclose(np.asarray(v), np.asarray(ref_v), rtol=1e-5, atol=1e-5)
    np.testing.assert_allclose(np.asarray(prob), np.asarray(ref_prob),
                               rtol=1e-5, atol=1e-5)

    # --- small batch: same kernel, single grid step ---
    B = 8
    xb = jax.random.normal(k_bx, (B, n_inputs), jnp.float32)
    signsb = jnp.where(jax.random.bernoulli(k_bs, 0.5, (B, n_outputs)), 1.0, -1.0)
    ob, vb, pb = a2c_forward(xb, signsb, wx, wo)
    jax.block_until_ready((ob, vb, pb))

    ref_b = jax.vmap(lambda xx, ss: _reference_forward(xx, params, ss))(xb, signsb)
    np.testing.assert_allclose(np.asarray(ob), np.asarray(ref_b[0]), rtol=1e-5, atol=1e-5)
    np.testing.assert_allclose(np.asarray(vb), np.asarray(ref_b[1]), rtol=1e-5, atol=1e-5)
    np.testing.assert_allclose(np.asarray(pb), np.asarray(ref_b[2]), rtol=1e-5, atol=1e-5)

    # --- larger batch: exercises the multi-step (2-tile) grid path ---
    Bg = 1040
    xg = jax.random.normal(k_gx, (Bg, n_inputs), jnp.float32)
    signsg = jnp.where(jax.random.bernoulli(k_gs, 0.5, (Bg, n_outputs)), 1.0, -1.0)
    og, vg, pg = a2c_forward(xg, signsg, wx, wo)
    jax.block_until_ready((og, vg, pg))

    ref_g = jax.vmap(lambda xx, ss: _reference_forward(xx, params, ss))(xg, signsg)
    np.testing.assert_allclose(np.asarray(og), np.asarray(ref_g[0]), rtol=1e-5, atol=1e-5)
    np.testing.assert_allclose(np.asarray(vg), np.asarray(ref_g[1]), rtol=1e-5, atol=1e-5)
    np.testing.assert_allclose(np.asarray(pg), np.asarray(ref_g[2]), rtol=1e-5, atol=1e-5)

    print("KERNEL_OK")
</pallas_src>

<mosaic_0001>
module attributes {stable_mosaic.version = 11 : i64} {
  func.func @_a2c_kernel(%arg0: i32, %arg1: memref<8x128xf32, #tpu.memory_space<vmem>>, %arg2: memref<128x128xf32, #tpu.memory_space<vmem>>, %arg3: memref<128x128xf32, #tpu.memory_space<vmem>>, %arg4: memref<8x128xf32, #tpu.memory_space<vmem>>) attributes {dimension_semantics = [#tpu.dimension_semantics<parallel>], iteration_bounds = array<i64: 1>, scalar_prefetch = 0 : i64, scratch_operands = 0 : i64, tpu.core_type = #tpu.core_type<tc>, window_params = [{transform_indices = @transform_0, window_bounds = array<i64: 8, 128>}, {pipeline_mode = #tpu.pipeline_mode<synchronous>, transform_indices = @transform_1, window_bounds = array<i64: 128, 128>}, {pipeline_mode = #tpu.pipeline_mode<synchronous>, transform_indices = @transform_2, window_bounds = array<i64: 128, 128>}, {transform_indices = @transform_3, window_bounds = array<i64: 8, 128>}]} {
    %c0 = arith.constant 0 : index
    %c0_0 = arith.constant 0 : index
    %0 = vector.load %arg1[%c0, %c0_0] : memref<8x128xf32, #tpu.memory_space<vmem>>, vector<8x128xf32>
    %c0_1 = arith.constant 0 : index
    %c0_2 = arith.constant 0 : index
    %1 = vector.load %arg2[%c0_1, %c0_2] : memref<128x128xf32, #tpu.memory_space<vmem>>, vector<128x128xf32>
    %cst = arith.constant dense<0.000000e+00> : vector<8x128xf32>
    %2 = tpu.matmul %0, %1, %cst {dimension_numbers = #tpu.dot_dimension_numbers<[1], [0], [0], [1], [0, 0, 1, 1], [], []>} : vector<8x128xf32>, vector<128x128xf32>, vector<8x128xf32> -> vector<8x128xf32>
    %3 = arith.negf %2 : vector<8x128xf32>
    %4 = math.exp %3 : vector<8x128xf32>
    %cst_3 = arith.constant 1.000000e+00 : f32
    %5 = vector.broadcast %cst_3 : f32 to vector<8x128xf32>
    %6 = arith.addf %5, %4 : vector<8x128xf32>
    %7 = arith.divf %5, %6 : vector<8x128xf32>
    %c0_4 = arith.constant 0 : index
    %c0_5 = arith.constant 0 : index
    %8 = vector.load %arg3[%c0_4, %c0_5] : memref<128x128xf32, #tpu.memory_space<vmem>>, vector<128x128xf32>
    %cst_6 = arith.constant dense<0.000000e+00> : vector<8x128xf32>
    %9 = tpu.matmul %7, %8, %cst_6 {dimension_numbers = #tpu.dot_dimension_numbers<[1], [0], [0], [1], [0, 0, 1, 1], [], []>} : vector<8x128xf32>, vector<128x128xf32>, vector<8x128xf32> -> vector<8x128xf32>
    %10 = arith.addf %2, %9 : vector<8x128xf32>
    %11 = arith.negf %10 : vector<8x128xf32>
    %12 = math.exp %11 : vector<8x128xf32>
    %cst_7 = arith.constant 1.000000e+00 : f32
    %13 = vector.broadcast %cst_7 : f32 to vector<8x128xf32>
    %14 = arith.addf %13, %12 : vector<8x128xf32>
    %15 = arith.divf %13, %14 : vector<8x128xf32>
    %16 = vector.extract_strided_slice %15 {offsets = [0, 9], sizes = [8, 1], strides = [1, 1]} : vector<8x128xf32> to vector<8x1xf32>
    %cst_8 = arith.constant 1.000000e+00 : f32
    %17 = vector.broadcast %cst_8 : f32 to vector<8x1xf32>
    %18 = arith.subf %17, %16 : vector<8x1xf32>
    %cst_9 = arith.constant 1.1920929E-7 : f32
    %19 = vector.broadcast %cst_9 : f32 to vector<8x1xf32>
    %20 = arith.addf %18, %19 : vector<8x1xf32>
    %21 = tpu.iota {dimensions = array<i32: 1>} : vector<8x128xi32>
    %c8_i32 = arith.constant 8 : i32
    %22 = vector.broadcast %c8_i32 : i32 to vector<8x128xi32>
    %23 = arith.cmpi slt, %21, %22 : vector<8x128xi32>
    %24 = vector.broadcast %20 : vector<8x1xf32> to vector<8x128xf32>
    %25 = arith.mulf %0, %24 : vector<8x128xf32>
    %26 = arith.addf %7, %25 : vector<8x128xf32>
    %c8_i32_10 = arith.constant 8 : i32
    %27 = vector.broadcast %c8_i32_10 : i32 to vector<8x128xi32>
    %28 = arith.cmpi eq, %21, %27 : vector<8x128xi32>
    %29 = arith.select %28, %10, %15 : vector<8x128xi1>, vector<8x128xf32>
    %30 = arith.select %23, %26, %29 : vector<8x128xi1>, vector<8x128xf32>
    %c0_11 = arith.constant 0 : index
    %c0_12 = arith.constant 0 : index
    %31 = vector.load %arg4[%c0_11, %c0_12] : memref<8x128xf32, #tpu.memory_space<vmem>>, vector<8x128xf32>
    tpu.vector_store %arg4[%c0_11, %c0_12], %30 {strides = array<i32>} : memref<8x128xf32, #tpu.memory_space<vmem>>, vector<8x128xf32>,
    return
  }
  func.func @transform_0(%arg0: i32) -> (i32, i32) {
    %c0_i32 = arith.constant 0 : i32
    %c0_i32_0 = arith.constant 0 : i32
    return %arg0, %c0_i32 : i32, i32
  }
  func.func @transform_1(%arg0: i32) -> (i32, i32) {
    %c0_i32 = arith.constant 0 : i32
    %c0_i32_0 = arith.constant 0 : i32
    %c0_i32_1 = arith.constant 0 : i32
    return %c0_i32, %c0_i32_0 : i32, i32
  }
  func.func @transform_2(%arg0: i32) -> (i32, i32) {
    %c0_i32 = arith.constant 0 : i32
    %c0_i32_0 = arith.constant 0 : i32
    %c0_i32_1 = arith.constant 0 : i32
    return %c0_i32, %c0_i32_0 : i32, i32
  }
  func.func @transform_3(%arg0: i32) -> (i32, i32) {
    %c0_i32 = arith.constant 0 : i32
    %c0_i32_0 = arith.constant 0 : i32
    return %arg0, %c0_i32 : i32, i32
  }
}

</mosaic_0001>

<bundles_post_ra>
// kernel: a2c_forward.1
= control target key start
LH: loop header
LB: loop body
LE: loop exit
PB: predicated region body
PF: predicated region fallthrough
CT: control target
= control target key end

     0   :  { %8 = vsyncpa [#allocation3], 0  ;;  %s547_s0 = inlined_call_operand.vmem [shape: f32[8,128], index: 0, kind: input, shape index: {}]   ;;  %s548_s1 = inlined_call_operand.hbm [shape: f32[128,128], index: 1, kind: input, shape index: {}]   ;;  %s549_s2 = inlined_call_operand.hbm [shape: f32[128,128], index: 2, kind: input, shape index: {}]   ;;  %s550_s3 = inlined_call_operand.vmem [shape: f32[8,128], index: 3, kind: output, shape index: {}]  }
   0x1   :  { %9 = vsyncpa [#allocation5], 0  ;;  %s469_s12 = smov [#allocation2]   ;;  %s421_s16 = scalar_lea.hbm %s548_s1, 2048 }
   0x2   :  { %s17_s13 = sshll.u32 %s469_s12, 4  ;;  %p422_p0 = scmp.ne.s32.totalorder %s548_s1, %s421_s16  ;;  %s18_s13 = int_to_ptr.vmem [resolvable:$true] %s17_s13 }
   0x3   :  { %p425_p1 = scmp.lt.u32.totalorder %s421_s16, %s548_s1 }
   0x5   :  { %p427_p2 = pnand %p425_p1, %p422_p0 }
   0x7   :  { %430 = shalt.err (!%p427_p2)
}
   0x8   :  { %s431_s21 = scalar_lea.vmem %s18_s13, 2048  ;;  %p436_p4 = scmp.lt.s32.totalorder %s18_s13, %s18_s13 }
   0x9   :  { %p432_p3 = scmp.ne.s32.totalorder %s18_s13, %s431_s21  ;;  %p437_p5 = scmp.lt.s32.totalorder %s431_s21, %s431_s21 }
   0xb   :  { %p438_p6 = por %p437_p5, %p436_p4 }
   0xd   :  { %p439_p7 = pnand %p438_p6, %p432_p3 }
   0xf   :  { %442 = shalt.err (!%p439_p7)
}
  0x10   :  { %s470_s22 = smov 128   ;;  %s471_s23 = smov 8  }
  0x11   :  { %23 = dma.hbm_to_vmem [thread:$0]  %s548_s1, 2048, %s18_s13, [#allocation3], %s470_s22, %s470_s22, %s471_s23  }
  0x12   :  { %s472_s26 = smov [#allocation4]   ;;  %s443_s30 = scalar_lea.hbm %s549_s2, 2048 }
  0x13   :  { %s29_s27 = sshll.u32 %s472_s26, 4  ;;  %p444_p8 = scmp.ne.s32.totalorder %s549_s2, %s443_s30  ;;  %s30_s27 = int_to_ptr.vmem [resolvable:$true] %s29_s27 }
  0x14   :  { %p447_p9 = scmp.lt.u32.totalorder %s443_s30, %s549_s2 }
  0x16   :  { %p449_p10 = pnand %p447_p9, %p444_p8 }
  0x18   :  { %452 = shalt.err (!%p449_p10)
}
  0x19   :  { %s453_s8 = scalar_lea.vmem %s30_s27, 2048  ;;  %p458_p12 = scmp.lt.s32.totalorder %s30_s27, %s30_s27 }
  0x1a   :  { %p454_p11 = scmp.ne.s32.totalorder %s30_s27, %s453_s8  ;;  %p459_p13 = scmp.lt.s32.totalorder %s453_s8, %s453_s8 }
  0x1c   :  { %p460_p0 = por %p459_p13, %p458_p12 }
  0x1e   :  { %p461_p1 = pnand %p460_p0, %p454_p11 }
  0x20   :  { %464 = shalt.err (!%p461_p1)
}
  0x21   :  { %35 = dma.hbm_to_vmem [thread:$0]  %s549_s2, 2048, %s30_s27, [#allocation5], %s470_s22, %s470_s22, %s471_s23  }
  0x22   :  { %465 = dma.done.wait [#allocation3], 2048  }
  0x23   :  { %466 = vsyncadd [#allocation3], 4294965248 }
  0x24   :  { %467 = dma.done.wait [#allocation5], 2048  }
  0x25   :  { %468 = vsyncadd [#allocation5], 4294965248  ;;  %v473_v0 = vmov 0.0|0.0   ;;  %vm474_vm0 = vmmov 0   ;;  %v475_v1 = vmov 0.0   ;;  %v43_v2 = vld [vmem:[#allocation2] sm:$0xff] }
  0x26   :  { %356 = vmatprep.subr.bf16.mxu0 %v473_v0  ;;  %318 = vmatprep.mubr.msk.f32.mxu0 %vm474_vm0, %v475_v1  ;;  %v44_v3 = vld [vmem:[#allocation2 + $0x8] sm:$0xff]  ;;  %v45_v4 = vld [vmem:[#allocation2 + $0x10] sm:$0xff]  ;;  %v46_v6 = vld [vmem:[#allocation2 + $0x18] sm:$0xff]  ;;  %v476_v57 = vmov 9  }
  0x27   :  { %380 = vmatprep.subr.bf16.mxu1 %v473_v0  ;;  %353 = vmatprep.mubr.msk.f32.mxu1 %vm474_vm0, %v475_v1  ;;  %v357_v5 = vpack.c.bf16 %v44_v3, %v43_v2  ;;  %v360_v7 = vpack.c.bf16 %v46_v6, %v45_v4  ;;  %v47_v8 = vld [vmem:[#allocation2 + $0x20] sm:$0xff]  ;;  %v48_v9 = vld [vmem:[#allocation2 + $0x28] sm:$0xff]  ;;  %v49_v14 = vld [vmem:[#allocation2 + $0x30] sm:$0xff] }
  0x28   :  { %v135_v10 = vld [vmem:[#allocation4] sm:$0xff]  ;;  %v136_v11 = vld [vmem:[#allocation4 + $0x8] sm:$0xff]  ;;  %v363_v12 = vpack.c.bf16 %v48_v9, %v47_v8  ;;  %v50_v15 = vld [vmem:[#allocation2 + $0x38] sm:$0xff]  ;;  %412 = vset.pattern.permute.xlu0 %v476_v57 }
  0x29   :  { %358 = vmatpush3.bf16.msra.mxu0 %v357_v5  ;;  %v381_v13 = vpack.c.bf16 %v136_v11, %v135_v10  ;;  %v366_v16 = vpack.c.bf16 %v50_v15, %v49_v14  ;;  %v51_v17 = vld [vmem:[#allocation2 + $0x40] sm:$0xff]  ;;  %v52_v18 = vld [vmem:[#allocation2 + $0x48] sm:$0xff]  ;;  %v53_v20 = vld [vmem:[#allocation2 + $0x50] sm:$0xff] }
  0x2a   :  { %359 = vmatprep.subr.bf16.mxu0 %v473_v0  ;;  %v369_v19 = vpack.c.bf16 %v52_v18, %v51_v17  ;;  %v54_v21 = vld [vmem:[#allocation2 + $0x58] sm:$0xff]  ;;  %v55_v23 = vld [vmem:[#allocation2 + $0x60] sm:$0xff]  ;;  %v56_v24 = vld [vmem:[#allocation2 + $0x68] sm:$0xff] }
  0x2b   :  { %382 = vmatpush3.bf16.msra.mxu1 %v381_v13  ;;  %v372_v22 = vpack.c.bf16 %v54_v21, %v53_v20  ;;  %v375_v25 = vpack.c.bf16 %v56_v24, %v55_v23  ;;  %v57_v26 = vld [vmem:[#allocation2 + $0x70] sm:$0xff]  ;;  %v58_v27 = vld [vmem:[#allocation2 + $0x78] sm:$0xff]  ;;  %v534_v29 = vld [vmem:[%s547_s0] sm:$0xff] }
  0x2c   :  { %383 = vmatprep.subr.bf16.mxu1 %v473_v0  ;;  %v378_v28 = vpack.c.bf16 %v58_v27, %v57_v26  ;;  %v137_v30 = vld [vmem:[#allocation4 + $0x10] sm:$0xff]  ;;  %v138_v31 = vld [vmem:[#allocation4 + $0x18] sm:$0xff]  ;;  %v139_v33 = vld [vmem:[#allocation4 + $0x20] sm:$0xff] }
  0x2d   :  { %361 = vmatpush3.bf16.msra.mxu0 %v360_v7  ;;  %v384_v32 = vpack.c.bf16 %v138_v31, %v137_v30  ;;  %v140_v34 = vld [vmem:[#allocation4 + $0x28] sm:$0xff]  ;;  %v141_v36 = vld [vmem:[#allocation4 + $0x30] sm:$0xff]  ;;  %v142_v37 = vld [vmem:[#allocation4 + $0x38] sm:$0xff] }
  0x2e   :  { %362 = vmatprep.subr.bf16.mxu0 %v473_v0  ;;  %v387_v35 = vpack.c.bf16 %v140_v34, %v139_v33  ;;  %v390_v38 = vpack.c.bf16 %v142_v37, %v141_v36  ;;  %v143_v39 = vld [vmem:[#allocation4 + $0x40] sm:$0xff]  ;;  %v144_v40 = vld [vmem:[#allocation4 + $0x48] sm:$0xff]  ;;  %v145_v42 = vld [vmem:[#allocation4 + $0x50] sm:$0xff] }
  0x2f   :  { %385 = vmatpush3.bf16.msra.mxu1 %v384_v32  ;;  %v393_v41 = vpack.c.bf16 %v144_v40, %v143_v39  ;;  %v146_v43 = vld [vmem:[#allocation4 + $0x58] sm:$0xff]  ;;  %v147_v45 = vld [vmem:[#allocation4 + $0x60] sm:$0xff]  ;;  %v148_v46 = vld [vmem:[#allocation4 + $0x68] sm:$0xff] }
  0x30   :  { %386 = vmatprep.subr.bf16.mxu1 %v473_v0  ;;  %v396_v44 = vpack.c.bf16 %v146_v43, %v145_v42  ;;  %v399_v47 = vpack.c.bf16 %v148_v46, %v147_v45  ;;  %v149_v48 = vld [vmem:[#allocation4 + $0x70] sm:$0xff]  ;;  %v150_v49 = vld [vmem:[#allocation4 + $0x78] sm:$0xff] }
  0x31   :  { %364 = vmatpush3.bf16.msra.mxu0 %v363_v12  ;;  %v402_v50 = vpack.c.bf16 %v150_v49, %v149_v48 }
  0x32   :  { %365 = vmatprep.subr.bf16.mxu0 %v473_v0 }
  0x33   :  { %388 = vmatpush3.bf16.msra.mxu1 %v387_v35 }
  0x34   :  { %389 = vmatprep.subr.bf16.mxu1 %v473_v0 }
  0x35   :  { %367 = vmatpush3.bf16.msra.mxu0 %v366_v16 }
  0x36   :  { %368 = vmatprep.subr.bf16.mxu0 %v473_v0 }
  0x37   :  { %391 = vmatpush3.bf16.msra.mxu1 %v390_v38 }
  0x38   :  { %392 = vmatprep.subr.bf16.mxu1 %v473_v0 }
  0x39   :  { %370 = vmatpush3.bf16.msra.mxu0 %v369_v19 }
  0x3a   :  { %371 = vmatprep.subr.bf16.mxu0 %v473_v0 }
  0x3b   :  { %394 = vmatpush3.bf16.msra.mxu1 %v393_v41 }
  0x3c   :  { %395 = vmatprep.subr.bf16.mxu1 %v473_v0 }
  0x3d   :  { %373 = vmatpush3.bf16.msra.mxu0 %v372_v22 }
  0x3e   :  { %374 = vmatprep.subr.bf16.mxu0 %v473_v0 }
  0x3f   :  { %397 = vmatpush3.bf16.msra.mxu1 %v396_v44 }
  0x40   :  { %398 = vmatprep.subr.bf16.mxu1 %v473_v0 }
  0x41   :  { %376 = vmatpush3.bf16.msra.mxu0 %v375_v25 }
  0x42   :  { %377 = vmatprep.subr.bf16.mxu0 %v473_v0 }
  0x43   :  { %400 = vmatpush3.bf16.msra.mxu1 %v399_v47 }
  0x44   :  { %401 = vmatprep.subr.bf16.mxu1 %v473_v0  ;;  %v230_v0 = vlaneseq }
  0x45   :  { %379 = vmatpush3.bf16.msra.mxu0 %v378_v28 }
  0x46   :  { %v231_v1 = vand.u32 127, %v230_v0 }
  0x47   :  { %403 = vmatpush3.bf16.msra.mxu1 %v402_v50 }
  0x48   :  { %319 = vmatmul.mubr.f32.vlgmr.msra.gmra.mrb[0].mxu0 %v534_v29  ;;  %vm240_vm1 = vcmp.eq.s32.totalorder %v231_v1, 8  ;;  %vm232_vm2 = vcmp.lt.s32.totalorder %v231_v1, 8 }
 0x11b   :  { %v125_v51 = vpop.f32.mrb[0].mxu0 }
 0x11c   :  { %v250_v52 = vmul.f32 -1.442695, %v125_v51  ;;  %v320_v53 = vpop.f32.mrb[1].mxu0 }
 0x11e   :  { %413 = vpow2.f32 %v250_v52 }
 0x128   :  { %v414_v54 = vpop.eup %413 }
 0x129   :  { %v132_v55 = vadd.f32 1.0, %v414_v54 }
 0x12b   :  { %415 = vrcp.f32 %v132_v55 }
 0x135   :  { %v416_v56 = vpop.eup %415 }
 0x136   :  { %354 = vmatmul.mubr.f32.vlgmr.msra.gmra.mrb[0].mxu1 %v416_v56 }
 0x209   :  { %v217_v58 = vpop.f32.mrb[0].mxu1 }
 0x20a   :  { %v221_v59 = vadd.f32 %v217_v58, %v125_v51  ;;  %v355_v60 = vpop.f32.mrb[1].mxu1 }
 0x20c   :  { %v251_v61 = vmul.f32 -1.442695, %v221_v59 }
 0x20e   :  { %417 = vpow2.f32 %v251_v61 }
 0x218   :  { %v418_v62 = vpop.eup %417 }
 0x219   :  { %v225_v63 = vadd.f32 1.0, %v418_v62 }
 0x21b   :  { %419 = vrcp.f32 %v225_v63 }
 0x225   :  { %v420_v2 = vpop.eup %419 }
 0x226   :  { %v241_v3 = vsel %vm240_vm1, %v221_v59, %v420_v2  ;;  %v228_v4 = vsub.f32 1.0, %v420_v2 }
 0x228   :  { %v229_v5 = vadd.f32 1.1920929e-07, %v228_v4 }
 0x22a   :  { %235 = vperm.xlu0 %412, %v229_v5  }
 0x2a9   :  { %v236_v6 = vpop.permute.xlu0 %235 }
 0x2aa   :  { %v238_v7 = vmul.f32 %v236_v6, %v534_v29 }
 0x2ac   :  { %v239_v8 = vadd.f32 %v416_v56, %v238_v7 }
 0x2ae   :  { %v242_v9 = vsel %vm232_vm2, %v239_v8, %v241_v3 }
 0x2af   :  { %243 = vst [vmem:[%s550_s3] sm:$0xff] %v242_v9 }
 0x2b0   :  { %248 = vsyncpa [#allocation3], 1 }
 0x2b1   :  { %249 = vsyncpa [#allocation5], 1 }

</bundles_post_ra>
